<compile_context>
chip_gen: v7x
topology: tpu7x:2x2x1
jax: 0.10.0
libtpu: 0.0.40
codegen_flags: <defaults>
</compile_context>

<pallas_src>
import math

import jax
import jax.numpy as jnp
from jax.experimental import pallas as pl
from jax.experimental.pallas import tpu as pltpu

_LANE = 128


def _round_up(x: int, m: int) -> int:
    return ((x + m - 1) // m) * m


def _sublane_multiple(dtype) -> int:
    # Native sublane tile by dtype: f32 -> 8, bf16 -> 16, int8/fp8 -> 32.
    itemsize = jnp.dtype(dtype).itemsize
    return max(8, 32 // max(itemsize, 1))


# ---------------------------------------------------------------------------
# Kernels
# ---------------------------------------------------------------------------

def _linear_resident_kernel(x_ref, wt_ref, b_ref, o_ref):
    # Whole W^T (Kp, Np) + bias resident in VMEM; one full-K MXU contraction
    # per M tile.  Bias added against the f32 result, single cast + store.
    acc = jnp.dot(x_ref[...], wt_ref[...], preferred_element_type=jnp.float32)
    o_ref[...] = (acc + b_ref[...].astype(jnp.float32)).astype(o_ref.dtype)


def _linear_tiled_kernel_f32(x_ref, wt_ref, b_ref, o_ref):
    # f32 output: the output block is resident across the K axis, so accumulate
    # straight into it (no scratch).  Bias is folded into the k==0 init.
    k = pl.program_id(2)

    @pl.when(k == 0)
    def _():
        o_ref[...] = jnp.broadcast_to(b_ref[...].astype(jnp.float32), o_ref.shape)

    o_ref[...] += jnp.dot(x_ref[...], wt_ref[...], preferred_element_type=jnp.float32)


def _linear_tiled_kernel(x_ref, wt_ref, b_ref, o_ref, acc_ref):
    # Low-precision output: f32 scratch accumulator, bias folded into the init,
    # single cast + store on the last K step.
    k = pl.program_id(2)

    @pl.when(k == 0)
    def _():
        acc_ref[...] = jnp.broadcast_to(b_ref[...].astype(jnp.float32), acc_ref.shape)

    acc_ref[...] += jnp.dot(x_ref[...], wt_ref[...], preferred_element_type=jnp.float32)

    @pl.when(k == pl.num_programs(2) - 1)
    def _():
        o_ref[...] = acc_ref[...].astype(o_ref.dtype)


# ---------------------------------------------------------------------------
# Wrapper
# ---------------------------------------------------------------------------

def make_perceptron(
    weight,
    bias,
    *,
    tm_max: int = 512,
    tn_max: int = 512,
    tk_max: int = 512,
    compute_dtype=None,                      # e.g. jnp.bfloat16 on v6e/v7x
    resident_w_bytes_max: int = 16 * 2**20,  # keep W^T VMEM-resident below this
):
    """Pre-process PyTorch-layout params once; return jitted forward(x)."""
    weight = jnp.asarray(weight)
    bias = jnp.asarray(bias)
    D_out, D_in = weight.shape

    # Static tile / padded layout for the N and K axes (done ONCE).
    tk = min(tk_max, _round_up(D_in, _LANE))
    Kp = _round_up(D_in, tk)
    tn = min(tn_max, _round_up(D_out, _LANE))
    Np = _round_up(D_out, tn)

    # One-time weight layout: (D_out, D_in) -> transposed, zero-padded (Kp, Np).
    wtp = jnp.zeros((Kp, Np), weight.dtype).at[:D_in, :D_out].set(weight.T)
    if compute_dtype is not None:
        wtp = wtp.astype(compute_dtype)
    bp = jnp.zeros((1, Np), bias.dtype).at[0, :D_out].set(bias)

    w_bytes = Kp * Np * jnp.dtype(wtp.dtype).itemsize
    use_resident = w_bytes <= resident_w_bytes_max

    def _forward(x):
        B = x.shape[0]
        out_dtype = x.dtype

        xp = x if compute_dtype is None else x.astype(compute_dtype)
        in_itemsize = jnp.dtype(xp.dtype).itemsize
        out_itemsize = jnp.dtype(out_dtype).itemsize

        sub = _sublane_multiple(xp.dtype)
        tm = min(tm_max, _round_up(B, sub))
        Mp = _round_up(B, tm)
        # v7x megacore: prefer >=2 parallel M tiles over one maximal tile.
        if Mp // tm < 2 and tm % (2 * sub) == 0:
            tm //= 2
        gm = Mp // tm

        # Pad only the axes that actually need it; no-op at aligned real sizes.
        if Mp != B or Kp != D_in:
            xp = jnp.pad(xp, ((0, Mp - B), (0, Kp - D_in)))

        cost = pl.CostEstimate(
            flops=2 * B * D_in * D_out,
            transcendentals=0,
            bytes_accessed=(Mp * Kp * in_itemsize + w_bytes
                            + Np * bp.dtype.itemsize + Mp * Np * out_itemsize),
        )

        if use_resident:
            # W^T + bias loaded into VMEM exactly once; only x / y stream.
            footprint = (w_bytes + 2 * tm * Kp * in_itemsize
                         + 2 * tm * Np * out_itemsize + 2 * Np * 4)
            vmem_limit = int(min(max(2 * footprint, 32 * 2**20), 64 * 2**20))
            out = pl.pallas_call(
                _linear_resident_kernel,
                out_shape=jax.ShapeDtypeStruct((Mp, Np), out_dtype),
                grid_spec=pltpu.PrefetchScalarGridSpec(
                    num_scalar_prefetch=0,
                    grid=(gm,),
                    in_specs=[
                        pl.BlockSpec((tm, Kp), lambda i: (i, 0)),   # x tile
                        pl.BlockSpec((Kp, Np), lambda i: (0, 0)),   # whole W^T, resident
                        pl.BlockSpec((1, Np), lambda i: (0, 0)),    # bias row, resident
                    ],
                    out_specs=pl.BlockSpec((tm, Np), lambda i: (i, 0)),
                ),
                compiler_params=pltpu.CompilerParams(
                    dimension_semantics=("parallel",),
                    vmem_limit_bytes=vmem_limit,
                ),
                cost_estimate=cost,
            )(xp, wtp, bp)
        else:
            gn, gk = Np // tn, Kp // tk
            footprint = (2 * tm * tk * in_itemsize
                         + 2 * tk * tn * jnp.dtype(wtp.dtype).itemsize
                         + 2 * tm * tn * out_itemsize + 2 * tn * 4
                         + tm * tn * 4)
            vmem_limit = int(min(max(2 * footprint, 32 * 2**20), 64 * 2**20))
            if out_dtype == jnp.float32:
                kernel, scratch = _linear_tiled_kernel_f32, []
            else:
                kernel, scratch = _linear_tiled_kernel, [pltpu.VMEM((tm, tn), jnp.float32)]
            out = pl.pallas_call(
                kernel,
                out_shape=jax.ShapeDtypeStruct((Mp, Np), out_dtype),
                grid_spec=pltpu.PrefetchScalarGridSpec(
                    num_scalar_prefetch=0,
                    grid=(gm, gn, gk),
                    in_specs=[
                        pl.BlockSpec((tm, tk), lambda i, j, k: (i, k)),   # x
                        pl.BlockSpec((tk, tn), lambda i, j, k: (k, j)),   # W^T
                        pl.BlockSpec((1, tn), lambda i, j, k: (0, j)),    # bias row
                    ],
                    out_specs=pl.BlockSpec((tm, tn), lambda i, j, k: (i, j)),
                    scratch_shapes=scratch,
                ),
                compiler_params=pltpu.CompilerParams(
                    dimension_semantics=("parallel", "parallel", "arbitrary"),
                    vmem_limit_bytes=vmem_limit,
                ),
                cost_estimate=cost,
            )(xp, wtp, bp)

        # Strip padding.
        return out[:B, :D_out]

    return jax.jit(_forward)


if __name__ == "__main__":
    input_dim = 3
    output_dim = 2
    batch = 8

    key = jax.random.PRNGKey(0)
    kx, kw, kb = jax.random.split(key, 3)

    # Deterministic init mirroring nn.Linear defaults: U(-1/sqrt(in), 1/sqrt(in))
    bound = 1.0 / math.sqrt(input_dim)
    weight = jax.random.uniform(kw, (output_dim, input_dim), jnp.float32, -bound, bound)
    bias = jax.random.uniform(kb, (output_dim,), jnp.float32, -bound, bound)
    x = jax.random.normal(kx, (batch, input_dim), jnp.float32)

    forward = make_perceptron(weight, bias)   # weight layout done ONCE here
    y = jax.block_until_ready(forward(x))

    # Reference check in plain JAX
    y_ref = x @ weight.T + bias
    assert y.shape == (batch, output_dim)
    assert jnp.allclose(y, y_ref, atol=1e-5, rtol=1e-5)

    print("KERNEL_OK")
</pallas_src>

<mosaic_0001>
module attributes {stable_mosaic.version = 11 : i64} {
  func.func @_linear_resident_kernel(%arg0: i32, %arg1: memref<8x128xf32, #tpu.memory_space<vmem>>, %arg2: memref<128x128xf32, #tpu.memory_space<vmem>>, %arg3: memref<1x128xf32, #tpu.memory_space<vmem>>, %arg4: memref<8x128xf32, #tpu.memory_space<vmem>>) attributes {dimension_semantics = [#tpu.dimension_semantics<parallel>], iteration_bounds = array<i64: 1>, scalar_prefetch = 0 : i64, scratch_operands = 0 : i64, tpu.core_type = #tpu.core_type<tc>, window_params = [{transform_indices = @transform_0, window_bounds = array<i64: 8, 128>}, {pipeline_mode = #tpu.pipeline_mode<synchronous>, transform_indices = @transform_1, window_bounds = array<i64: 128, 128>}, {pipeline_mode = #tpu.pipeline_mode<synchronous>, transform_indices = @transform_2, window_bounds = array<i64: 1, 128>}, {transform_indices = @transform_3, window_bounds = array<i64: 8, 128>}]} {
    %c0 = arith.constant 0 : index
    %c0_0 = arith.constant 0 : index
    %0 = vector.load %arg1[%c0, %c0_0] : memref<8x128xf32, #tpu.memory_space<vmem>>, vector<8x128xf32>
    %c0_1 = arith.constant 0 : index
    %c0_2 = arith.constant 0 : index
    %1 = vector.load %arg2[%c0_1, %c0_2] : memref<128x128xf32, #tpu.memory_space<vmem>>, vector<128x128xf32>
    %cst = arith.constant dense<0.000000e+00> : vector<8x128xf32>
    %2 = tpu.matmul %0, %1, %cst {dimension_numbers = #tpu.dot_dimension_numbers<[1], [0], [0], [1], [0, 0, 1, 1], [], []>} : vector<8x128xf32>, vector<128x128xf32>, vector<8x128xf32> -> vector<8x128xf32>
    %c0_3 = arith.constant 0 : index
    %c0_4 = arith.constant 0 : index
    %3 = vector.load %arg3[%c0_3, %c0_4] : memref<1x128xf32, #tpu.memory_space<vmem>>, vector<1x128xf32>
    %4 = vector.broadcast %3 : vector<1x128xf32> to vector<8x128xf32>
    %5 = arith.addf %2, %4 : vector<8x128xf32>
    %c0_5 = arith.constant 0 : index
    %c0_6 = arith.constant 0 : index
    %6 = vector.load %arg4[%c0_5, %c0_6] : memref<8x128xf32, #tpu.memory_space<vmem>>, vector<8x128xf32>
    tpu.vector_store %arg4[%c0_5, %c0_6], %5 {strides = array<i32>} : memref<8x128xf32, #tpu.memory_space<vmem>>, vector<8x128xf32>,
    return
  }
  func.func @transform_0(%arg0: i32) -> (i32, i32) {
    %c0_i32 = arith.constant 0 : i32
    %c0_i32_0 = arith.constant 0 : i32
    return %arg0, %c0_i32 : i32, i32
  }
  func.func @transform_1(%arg0: i32) -> (i32, i32) {
    %c0_i32 = arith.constant 0 : i32
    %c0_i32_0 = arith.constant 0 : i32
    %c0_i32_1 = arith.constant 0 : i32
    return %c0_i32, %c0_i32_0 : i32, i32
  }
  func.func @transform_2(%arg0: i32) -> (i32, i32) {
    %c0_i32 = arith.constant 0 : i32
    %c0_i32_0 = arith.constant 0 : i32
    %c0_i32_1 = arith.constant 0 : i32
    return %c0_i32, %c0_i32_0 : i32, i32
  }
  func.func @transform_3(%arg0: i32) -> (i32, i32) {
    %c0_i32 = arith.constant 0 : i32
    %c0_i32_0 = arith.constant 0 : i32
    return %arg0, %c0_i32 : i32, i32
  }
}

</mosaic_0001>

<bundles_post_ra>
// kernel: _forward.1
= control target key start
LH: loop header
LB: loop body
LE: loop exit
PB: predicated region body
PF: predicated region fallthrough
CT: control target
= control target key end

     0   :  { %8 = vsyncpa [#allocation3], 0  ;;  %s235_s12 = smov [#allocation2]   ;;  %s282_s0 = inlined_call_operand.vmem [shape: f32[8,128], index: 0, kind: input, shape index: {}]   ;;  %s283_s1 = inlined_call_operand.hbm [shape: f32[128,128], index: 1, kind: input, shape index: {}]   ;;  %s284_s2 = inlined_call_operand.vmem [shape: f32[1,128], index: 2, kind: input, shape index: {}]   ;;  %s285_s3 = inlined_call_operand.vmem [shape: f32[8,128], index: 3, kind: output, shape index: {}]  }
   0x1   :  { %s16_s13 = sshll.u32 %s235_s12, 4  ;;  %s211_s16 = scalar_lea.hbm %s283_s1, 2048  ;;  %s17_s13 = int_to_ptr.vmem [resolvable:$true] %s16_s13 }
   0x2   :  { %p212_p0 = scmp.ne.s32.totalorder %s283_s1, %s211_s16  ;;  %p215_p1 = scmp.lt.u32.totalorder %s211_s16, %s283_s1 }
   0x4   :  { %p217_p2 = pnand %p215_p1, %p212_p0 }
   0x6   :  { %220 = shalt.err (!%p217_p2)
}
   0x7   :  { %s221_s21 = scalar_lea.vmem %s17_s13, 2048  ;;  %p226_p4 = scmp.lt.s32.totalorder %s17_s13, %s17_s13 }
   0x8   :  { %p222_p3 = scmp.ne.s32.totalorder %s17_s13, %s221_s21  ;;  %p227_p5 = scmp.lt.s32.totalorder %s221_s21, %s221_s21 }
   0xa   :  { %p228_p6 = por %p227_p5, %p226_p4 }
   0xc   :  { %p229_p7 = pnand %p228_p6, %p222_p3 }
   0xe   :  { %232 = shalt.err (!%p229_p7)
}
   0xf   :  { %s236_s22 = smov 128   ;;  %s237_s23 = smov 8  }
  0x10   :  { %22 = dma.hbm_to_vmem [thread:$0]  %s283_s1, 2048, %s17_s13, [#allocation3], %s236_s22, %s236_s22, %s237_s23  }
  0x11   :  { %233 = dma.done.wait [#allocation3], 2048  }
  0x12   :  { %234 = vsyncadd [#allocation3], 4294965248  ;;  %v238_v0 = vmov 0.0|0.0   ;;  %vm239_vm0 = vmmov 0   ;;  %v240_v1 = vmov 0.0   ;;  %v29_v2 = vld [vmem:[#allocation2] sm:$0xff] }
  0x13   :  { %181 = vmatprep.subr.bf16.mxu0 %v238_v0  ;;  %178 = vmatprep.mubr.msk.f32.mxu0 %vm239_vm0, %v240_v1  ;;  %v30_v3 = vld [vmem:[#allocation2 + $0x8] sm:$0xff]  ;;  %v31_v4 = vld [vmem:[#allocation2 + $0x10] sm:$0xff]  ;;  %v32_v6 = vld [vmem:[#allocation2 + $0x18] sm:$0xff] }
  0x14   :  { %v182_v5 = vpack.c.bf16 %v30_v3, %v29_v2  ;;  %v185_v7 = vpack.c.bf16 %v32_v6, %v31_v4  ;;  %v33_v8 = vld [vmem:[#allocation2 + $0x20] sm:$0xff]  ;;  %v34_v9 = vld [vmem:[#allocation2 + $0x28] sm:$0xff]  ;;  %v35_v11 = vld [vmem:[#allocation2 + $0x30] sm:$0xff] }
  0x15   :  { %v188_v10 = vpack.c.bf16 %v34_v9, %v33_v8  ;;  %v36_v12 = vld [vmem:[#allocation2 + $0x38] sm:$0xff]  ;;  %v37_v14 = vld [vmem:[#allocation2 + $0x40] sm:$0xff]  ;;  %v38_v15 = vld [vmem:[#allocation2 + $0x48] sm:$0xff] }
  0x16   :  { %183 = vmatpush3.bf16.msra.mxu0 %v182_v5  ;;  %v191_v13 = vpack.c.bf16 %v36_v12, %v35_v11  ;;  %v194_v16 = vpack.c.bf16 %v38_v15, %v37_v14  ;;  %v39_v17 = vld [vmem:[#allocation2 + $0x50] sm:$0xff]  ;;  %v40_v18 = vld [vmem:[#allocation2 + $0x58] sm:$0xff]  ;;  %v41_v20 = vld [vmem:[#allocation2 + $0x60] sm:$0xff] }
  0x17   :  { %184 = vmatprep.subr.bf16.mxu0 %v238_v0  ;;  %v197_v19 = vpack.c.bf16 %v40_v18, %v39_v17  ;;  %v42_v21 = vld [vmem:[#allocation2 + $0x68] sm:$0xff]  ;;  %v43_v23 = vld [vmem:[#allocation2 + $0x70] sm:$0xff]  ;;  %v44_v24 = vld [vmem:[#allocation2 + $0x78] sm:$0xff] }
  0x18   :  { %v200_v22 = vpack.c.bf16 %v42_v21, %v41_v20  ;;  %v203_v25 = vpack.c.bf16 %v44_v24, %v43_v23  ;;  %v28_v26 = vld [vmem:[%s282_s0] sm:$0xff] }
  0x19   :  { %v128_v27 = vld [vmem:[%s284_s2] ss:$0 sm:$0xff] }
  0x1a   :  { %186 = vmatpush3.bf16.msra.mxu0 %v185_v7 }
  0x1b   :  { %187 = vmatprep.subr.bf16.mxu0 %v238_v0 }
  0x1e   :  { %189 = vmatpush3.bf16.msra.mxu0 %v188_v10 }
  0x1f   :  { %190 = vmatprep.subr.bf16.mxu0 %v238_v0 }
  0x22   :  { %192 = vmatpush3.bf16.msra.mxu0 %v191_v13 }
  0x23   :  { %193 = vmatprep.subr.bf16.mxu0 %v238_v0 }
  0x26   :  { %195 = vmatpush3.bf16.msra.mxu0 %v194_v16 }
  0x27   :  { %196 = vmatprep.subr.bf16.mxu0 %v238_v0 }
  0x2a   :  { %198 = vmatpush3.bf16.msra.mxu0 %v197_v19 }
  0x2b   :  { %199 = vmatprep.subr.bf16.mxu0 %v238_v0 }
  0x2e   :  { %201 = vmatpush3.bf16.msra.mxu0 %v200_v22 }
  0x2f   :  { %202 = vmatprep.subr.bf16.mxu0 %v238_v0 }
  0x32   :  { %204 = vmatpush3.bf16.msra.mxu0 %v203_v25 }
  0x35   :  { %179 = vmatmul.mubr.f32.vlgmr.msra.gmra.mrb[0].mxu0 %v28_v26 }
 0x108   :  { %v118_v28 = vpop.f32.mrb[0].mxu0 }
 0x109   :  { %v119_v29 = vadd.f32 %v128_v27, %v118_v28  ;;  %v180_v30 = vpop.f32.mrb[1].mxu0 }
 0x10b   :  { %122 = vst [vmem:[%s285_s3] sm:$0xff] %v119_v29 }
 0x10c   :  { %127 = vsyncpa [#allocation3], 1 }

</bundles_post_ra>
